<compile_context>
chip_gen: v7x
topology: tpu7x:2x2x1
jax: 0.10.0
libtpu: 0.0.40
codegen_flags: <defaults>
</compile_context>

<pallas_src>
import functools

import numpy as np
import jax
import jax.numpy as jnp
from jax.experimental import pallas as pl
from jax.experimental.pallas import tpu as pltpu


def _segment_mean_kernel(mask_ref, x_ref, inv_ref, mean_ref, acc_ref):
    # mask_ref: (1, 1, tT) int32   sentence ids of this token tile (0 = padding)
    # x_ref:    (1, tT, tD)        token embeddings, native dtype (bf16/f32)
    # inv_ref:  (1, S, 1) f32      1 / max(count, 1) per sentence id
    # mean_ref: (1, S, tD)         per-sentence mean embeddings (x.dtype)
    # acc_ref:  (S, tD) f32        VMEM accumulator across the T grid axis
    t = pl.program_id(2)

    @pl.when(t == 0)
    def _init():
        acc_ref[...] = jnp.zeros_like(acc_ref)

    S = acc_ref.shape[0]
    mask = mask_ref[0]                       # (1, tT) int32
    x = x_ref[0]                             # (tT, tD), kept in native dtype (MXU input)
    sid = jax.lax.broadcasted_iota(jnp.int32, (S, mask.shape[1]), 0) + 1
    # One-hot selector in x.dtype (0/1 exact in bf16).  Cheap VPU work that is
    # << the MXU contraction for tD >= 128, so it is rebuilt per tile rather
    # than cached (caching would break megacore sharding of the D axis).
    onehot = (sid == mask).astype(x.dtype)   # (S, tT)
    acc_ref[...] += jnp.dot(onehot, x, preferred_element_type=jnp.float32)

    @pl.when(t == pl.num_programs(2) - 1)
    def _finalize():
        mean_ref[0] = (acc_ref[...] * inv_ref[0]).astype(mean_ref.dtype)


def _pick_tile(full, want, align):
    """Largest tile <= want that is a multiple of `align` and divides `full`,
    otherwise the full dimension (full-extent blocks are always legal)."""
    want = min(full, want)
    if full % align != 0 or want < align:
        return full
    want = (want // align) * align
    while full % want != 0:
        want -= align
    return want


@functools.partial(jax.jit, static_argnames=("num_sentences", "block_d", "block_t"))
def sentence_gather_dense(x, sentence_index, num_sentences, block_d=512, block_t=1024):
    """Dense hot path: (B, S, D) per-sentence means (x.dtype) and (B, S) counts."""
    B, T, D = x.shape
    S = int(num_sentences)
    si = sentence_index.astype(jnp.int32)

    # Lane-dense per-sentence token counts via plain XLA (kept out of the
    # kernel so the kernel has no last-dim-1 output).
    ids = jnp.arange(1, S + 1, dtype=jnp.int32)
    counts = jnp.sum(si[:, :, None] == ids[None, None, :], axis=1)   # (B, S) int32
    inv = 1.0 / jnp.maximum(counts.astype(jnp.float32), 1.0)          # exact reciprocal
    inv = inv[:, :, None]                                             # (B, S, 1)

    tD = _pick_tile(D, block_d, 128)   # lane-dense x loads / means stores
    tT = _pick_tile(T, block_t, 128)   # keeps the mask block (8,128)-legal
    grid = (B, D // tD, T // tT)

    means = pl.pallas_call(
        _segment_mean_kernel,
        out_shape=jax.ShapeDtypeStruct((B, S, D), x.dtype),
        grid_spec=pltpu.PrefetchScalarGridSpec(
            num_scalar_prefetch=0,
            grid=grid,
            in_specs=[
                pl.BlockSpec((1, 1, tT), lambda b, d, t: (b, 0, t)),
                pl.BlockSpec((1, tT, tD), lambda b, d, t: (b, t, d)),
                pl.BlockSpec((1, S, 1), lambda b, d, t: (b, 0, 0)),
            ],
            out_specs=pl.BlockSpec((1, S, tD), lambda b, d, t: (b, 0, d)),
            scratch_shapes=[pltpu.VMEM((S, tD), jnp.float32)],
        ),
        compiler_params=pltpu.CompilerParams(
            dimension_semantics=("parallel", "parallel", "arbitrary"),
        ),
    )(si.reshape(B, 1, T), x, inv)
    return means, counts


def sentence_gather(x, sentence_index, max_sentences=None, block_d=512, block_t=1024):
    """Matches SentenceGather(pool='avg').forward: list (len B) of
    (n_sentences_b, D) arrays; row i is the mean of tokens with sentence id
    i+1, skipping ids that have no tokens."""
    if max_sentences is None:
        # NOTE: device sync; pass max_sentences explicitly in a serving loop.
        max_sentences = int(jnp.max(sentence_index))
    # Bucket S to a power of two (>= 8): avoids a recompile per distinct
    # sentence count and aligns the MXU M dim.  Padded ids have count == 0 and
    # are filtered out below.
    S_pad = max(8, pl.next_power_of_2(max(int(max_sentences), 1)))
    means, counts = sentence_gather_dense(
        x, sentence_index, S_pad, block_d=block_d, block_t=block_t)
    means = np.asarray(jax.block_until_ready(means))
    counts = np.asarray(jax.block_until_ready(counts))
    return [means[b][counts[b] > 0] for b in range(x.shape[0])]


def _reference(x, sentence_index):
    # Pure-numpy transcription of the PyTorch forward.
    x = np.asarray(x)
    si = np.asarray(sentence_index)
    out = []
    for b in range(x.shape[0]):
        rows = []
        for i in range(int(si[b].max())):
            sel = x[b][si[b] == i + 1]
            if sel.shape[0] == 0:
                continue
            rows.append(sel.mean(0, keepdims=True))
        out.append(np.concatenate(rows, axis=0))
    return out


if __name__ == "__main__":
    B, T, D = 2, 256, 256
    key = jax.random.PRNGKey(0)
    x = jax.random.normal(key, (B, T, D), dtype=jnp.float32)

    # Deterministic sentence indices (0 = padding).  Batch 1 leaves sentence
    # id 4 empty to exercise the "empty sentence is skipped" branch; sentence 6
    # in batch 1 straddles the T-tile boundary to exercise the accumulator.
    tok = np.arange(T)
    si0 = np.where(tok < 160, tok // 16 + 1, 0)   # ids 1..10, then padding
    si1 = np.where(tok < 144, tok // 24 + 1, 0)   # ids 1..6, then padding
    si1 = np.where(si1 == 4, 5, si1)              # sentence 4 left empty
    sentence_index = jnp.asarray(np.stack([si0, si1]), dtype=jnp.int32)

    # block_d/block_t chosen small here to exercise the (B, D-tiles, T-tiles)
    # grid; production defaults (512 / 1024) stay well under v7x VMEM.
    got = sentence_gather(x, sentence_index, block_d=128, block_t=128)
    want = _reference(x, sentence_index)

    assert len(got) == len(want)
    for g, w in zip(got, want):
        assert g.shape == w.shape, (g.shape, w.shape)
        np.testing.assert_allclose(g, w, rtol=1e-5, atol=1e-5)

    print("KERNEL_OK")
</pallas_src>

<mosaic_0001>
module attributes {stable_mosaic.version = 11 : i64} {
  func.func @_segment_mean_kernel(%arg0: i32, %arg1: i32, %arg2: i32, %arg3: memref<1x1x128xi32, #tpu.memory_space<vmem>>, %arg4: memref<1x128x128xf32, #tpu.memory_space<vmem>>, %arg5: memref<1x16x1xf32, #tpu.memory_space<vmem>>, %arg6: memref<1x16x128xf32, #tpu.memory_space<vmem>>, %arg7: memref<16x128xf32, #tpu.memory_space<vmem>>) attributes {dimension_semantics = [#tpu.dimension_semantics<parallel>, #tpu.dimension_semantics<parallel>, #tpu.dimension_semantics<arbitrary>], iteration_bounds = array<i64: 2, 2, 2>, scalar_prefetch = 0 : i64, scratch_operands = 1 : i64, tpu.core_type = #tpu.core_type<tc>, window_params = [{transform_indices = @transform_0, window_bounds = array<i64: 1, 1, 128>}, {transform_indices = @transform_1, window_bounds = array<i64: 1, 128, 128>}, {transform_indices = @transform_2, window_bounds = array<i64: 1, 16, 1>}, {transform_indices = @transform_3, window_bounds = array<i64: 1, 16, 128>}]} {
    %c0_i32 = arith.constant 0 : i32
    %0 = arith.cmpi eq, %arg2, %c0_i32 : i32
    %1 = arith.extui %0 : i1 to i32
    %c0_i32_0 = arith.constant 0 : i32
    %2 = arith.cmpi ne, %1, %c0_i32_0 : i32
    scf.if %2 {
      %cst_12 = arith.constant 0.000000e+00 : f32
      %21 = vector.broadcast %cst_12 : f32 to vector<16x128xf32>
      %c0_13 = arith.constant 0 : index
      %c0_14 = arith.constant 0 : index
      %22 = vector.load %arg7[%c0_13, %c0_14] : memref<16x128xf32, #tpu.memory_space<vmem>>, vector<16x128xf32>
      tpu.vector_store %arg7[%c0_13, %c0_14], %21 {strides = array<i32>} : memref<16x128xf32, #tpu.memory_space<vmem>>, vector<16x128xf32>,
    } else {
    }
    %c0 = arith.constant 0 : index
    %c0_1 = arith.constant 0 : index
    %c0_2 = arith.constant 0 : index
    %3 = vector.load %arg3[%c0, %c0_1, %c0_2] : memref<1x1x128xi32, #tpu.memory_space<vmem>>, vector<1x1x128xi32>
    %4 = vector.shape_cast %3 : vector<1x1x128xi32> to vector<1x128xi32>
    %c0_3 = arith.constant 0 : index
    %c0_4 = arith.constant 0 : index
    %c0_5 = arith.constant 0 : index
    %5 = vector.load %arg4[%c0_3, %c0_4, %c0_5] : memref<1x128x128xf32, #tpu.memory_space<vmem>>, vector<1x128x128xf32>
    %6 = vector.shape_cast %5 : vector<1x128x128xf32> to vector<128x128xf32>
    %7 = tpu.iota {dimensions = array<i32: 0>} : vector<16x128xi32>
    %c1_i32 = arith.constant 1 : i32
    %8 = vector.broadcast %c1_i32 : i32 to vector<16x128xi32>
    %9 = arith.addi %7, %8 : vector<16x128xi32>
    %10 = vector.broadcast %4 : vector<1x128xi32> to vector<16x128xi32>
    %11 = arith.cmpi eq, %9, %10 : vector<16x128xi32>
    %12 = arith.extui %11 : vector<16x128xi1> to vector<16x128xi32>
    %13 = arith.sitofp %12 : vector<16x128xi32> to vector<16x128xf32>
    %c0_6 = arith.constant 0 : index
    %c0_7 = arith.constant 0 : index
    %14 = vector.load %arg7[%c0_6, %c0_7] : memref<16x128xf32, #tpu.memory_space<vmem>>, vector<16x128xf32>
    %cst = arith.constant dense<0.000000e+00> : vector<16x128xf32>
    %15 = tpu.matmul %13, %6, %cst {dimension_numbers = #tpu.dot_dimension_numbers<[1], [0], [0], [1], [0, 0, 1, 1], [], []>} : vector<16x128xf32>, vector<128x128xf32>, vector<16x128xf32> -> vector<16x128xf32>
    %16 = arith.addf %14, %15 : vector<16x128xf32>
    %c0_8 = arith.constant 0 : index
    %c0_9 = arith.constant 0 : index
    %17 = vector.load %arg7[%c0_8, %c0_9] : memref<16x128xf32, #tpu.memory_space<vmem>>, vector<16x128xf32>
    tpu.vector_store %arg7[%c0_8, %c0_9], %16 {strides = array<i32>} : memref<16x128xf32, #tpu.memory_space<vmem>>, vector<16x128xf32>,
    %c1_i32_10 = arith.constant 1 : i32
    %18 = arith.cmpi eq, %arg2, %c1_i32_10 : i32
    %19 = arith.extui %18 : i1 to i32
    %c0_i32_11 = arith.constant 0 : i32
    %20 = arith.cmpi ne, %19, %c0_i32_11 : i32
    scf.if %20 {
      %c0_12 = arith.constant 0 : index
      %c0_13 = arith.constant 0 : index
      %21 = vector.load %arg7[%c0_12, %c0_13] : memref<16x128xf32, #tpu.memory_space<vmem>>, vector<16x128xf32>
      %c0_14 = arith.constant 0 : index
      %c0_15 = arith.constant 0 : index
      %c0_16 = arith.constant 0 : index
      %22 = vector.load %arg5[%c0_14, %c0_15, %c0_16] : memref<1x16x1xf32, #tpu.memory_space<vmem>>, vector<1x16x1xf32>
      %23 = vector.shape_cast %22 : vector<1x16x1xf32> to vector<16x1xf32>
      %24 = vector.broadcast %23 : vector<16x1xf32> to vector<16x128xf32>
      %25 = arith.mulf %21, %24 : vector<16x128xf32>
      %c0_17 = arith.constant 0 : index
      %c0_18 = arith.constant 0 : index
      %c0_19 = arith.constant 0 : index
      %26 = vector.load %arg6[%c0_17, %c0_18, %c0_19] : memref<1x16x128xf32, #tpu.memory_space<vmem>>, vector<1x16x128xf32>
      %27 = vector.shape_cast %26 : vector<1x16x128xf32> to vector<16x128xf32>
      %28 = vector.shape_cast %25 : vector<16x128xf32> to vector<1x16x128xf32>
      tpu.vector_store %arg6[%c0_17, %c0_18, %c0_19], %28 {strides = array<i32>} : memref<1x16x128xf32, #tpu.memory_space<vmem>>, vector<1x16x128xf32>,
    } else {
    }
    return
  }
  func.func @transform_0(%arg0: i32, %arg1: i32, %arg2: i32) -> (i32, i32, i32) {
    %c0_i32 = arith.constant 0 : i32
    %c0_i32_0 = arith.constant 0 : i32
    return %arg0, %c0_i32, %arg2 : i32, i32, i32
  }
  func.func @transform_1(%arg0: i32, %arg1: i32, %arg2: i32) -> (i32, i32, i32) {
    %c0_i32 = arith.constant 0 : i32
    return %arg0, %arg2, %arg1 : i32, i32, i32
  }
  func.func @transform_2(%arg0: i32, %arg1: i32, %arg2: i32) -> (i32, i32, i32) {
    %c0_i32 = arith.constant 0 : i32
    %c0_i32_0 = arith.constant 0 : i32
    %c0_i32_1 = arith.constant 0 : i32
    return %arg0, %c0_i32, %c0_i32_0 : i32, i32, i32
  }
  func.func @transform_3(%arg0: i32, %arg1: i32, %arg2: i32) -> (i32, i32, i32) {
    %c0_i32 = arith.constant 0 : i32
    %c0_i32_0 = arith.constant 0 : i32
    return %arg0, %c0_i32, %arg1 : i32, i32, i32
  }
}

</mosaic_0001>

<bundles_post_ra>
// kernel: sentence_gather_dense.1
= control target key start
LH: loop header
LB: loop body
LE: loop exit
PB: predicated region body
PF: predicated region fallthrough
CT: control target
= control target key end

     0   :  { %s1289_s0 = inlined_call_operand.vmem [shape: s32[2,1,256], index: 0, kind: input, shape index: {}]   ;;  %s1290_s1 = inlined_call_operand.hbm [shape: f32[2,256,256], index: 1, kind: input, shape index: {}]   ;;  %s1291_s2 = inlined_call_operand.vmem [shape: f32[2,16,1], index: 2, kind: input, shape index: {}]   ;;  %s1292_s3 = inlined_call_operand.hbm [shape: f32[2,16,256], index: 3, kind: output, shape index: {}]  }
   0x1   :  { %1301 = sst [smem:[#allocation15_spill]] %s1292_s3 }
   0x2   :  { %8 = vsyncpa [#allocation4], 0 }
   0x3   :  { %10 = vsyncpa [#allocation4 + $0x1], 0 }
   0x4   :  { %11 = vsyncpa [#allocation5], 0 }
   0x5   :  { %13 = vsyncpa [#allocation5 + $0x1], 0  ;;  %s989_s12 = smov 0   ;;  %s991_s13 = smov 0  }
   0x6   :  { %s993_s14 = smov 0   ;;  %s995_s15 = smov 0  }
   0x7   :  { %s997_s16 = smov 0   ;;  %s999_s17 = smov 0  }
   0x8   :  { %s1001_s18 = smov 0   ;;  %s1003_s19 = smov 0  }
   0x9   :  { %s1005_s20 = smov 0   ;;  %s1007_s21 = smov 0  }
   0xa   :  { %s1009_s22 = smov 0   ;;  %s1011_s23 = smov 0  }
   0xb   :  { %s1013_s24 = smov 0  }
   0xc LB: > { %1302 = sst [smem:[#allocation9_spill]] %s908_s12  ;;  %s546_s25 = sadd.s32 4294967295, %s956_s24   ;;  %s956_s24 = sphi %s1013_s24, %s19_s24   ;;  %s952_s23 = sphi %s1011_s23, %s1334_s23   ;;  %s948_s22 = sphi %s1009_s22, %s1333_s22   ;;  %s944_s21 = sphi %s1007_s21, %s1322_s21   ;;  %s940_s20 = sphi %s1005_s20, %s1332_s20   ;;  %s936_s19 = sphi %s1003_s19, %s1331_s19   ;;  %s932_s18 = sphi %s1001_s18, %s1321_s18   ;;  %s928_s17 = sphi %s999_s17, %s1330_s17   ;;  %s924_s16 = sphi %s997_s16, %s1329_s16   ;;  %s920_s15 = sphi %s995_s15, %s1328_s15   ;;  %s916_s14 = sphi %s993_s14, %s1327_s14   ;;  %s912_s13 = sphi %s991_s13, %s1326_s13   ;;  %s908_s12 = sphi %s989_s12, %s1325_s12  }
   0xd   : > { %1303 = sst [smem:[#allocation10_spill]] %s944_s21  ;;  %s547_s26 = sadd.s32 4294967294, %s956_s24  }
   0xe   : > { %s31_s27 = sadd.s32 1, %s944_s21  ;;  %s34_s28 = sadd.s32 1, %s948_s22 }
   0xf   : > { %p32_p0 = scmp.ge.s32.totalorder %s31_s27, 2  ;;  %s38_s29 = sadd.s32 1, %s952_s23 }
  0x10   : > { %p84_p1 = scmp.ne.s32.totalorder %s928_s17, %s924_s16  ;;  %p85_p2 = scmp.eq.s32.totalorder %s956_s24, 0 }
  0x11   : > { %s1336_s27 = smov (%p32_p0, %s31_s27), 0  ;;  %s1338_s28 = smov (!%p32_p0, %s34_s28), %s948_s22 }
  0x12   : > { %1304 = sst [smem:[#allocation11_spill]] %s1336_s27  ;;  %s71_s4 = ssub.s32 %s944_s21, %s1336_s27 }
  0x13   : > { %p36_p3 = scmp.ge.s32.totalorder %s1338_s28, 2  ;;  %p90_p4 = scmp.ne.s32.totalorder %s924_s16, %s920_s15 }
  0x14   : > { %p1070_p5 = por %p85_p2, %p84_p1  ;;  %p91_p6 = scmp.eq.s32.totalorder %s546_s25, 0 }
  0x15   : > { %s1340_s28 = smov (%p36_p3, %s1338_s28), 0  ;;  %s1342_s29 = smov (!%p36_p3, %s38_s29), %s952_s23 }
  0x16   : > { %1306 = sst [smem:[#allocation12_spill]] %s1340_s28  ;;  %s73_s6 = ssub.s32 %s948_s22, %s1340_s28 }
  0x17   : > { %p1079_p7 = por %p91_p6, %p90_p4  ;;  %p40_p8 = scmp.ge.s32.totalorder %s1342_s29, 2 }
  0x18   : > { %s131_s8 = sadd.s32 1, %s916_s14  ;;  %p141_p9 = scmp.ne.s32.totalorder %s916_s14, %s912_s13 }
  0x19   : > { %p142_p10 = scmp.eq.s32.totalorder %s546_s25, 7  ;;  %s1344_s29 = smov (%p40_p8, %s1342_s29), 0 }
  0x1a   : > { %1308 = sst [smem:[#allocation13_spill]] %s1344_s29  ;;  %p147_p12 = scmp.ne.s32.totalorder %s912_s13, %s908_s12 }
  0x1b   : > { %p1088_p11 = por %p142_p10, %p141_p9  ;;  %s70_s10 = ssub.s32 %s952_s23, %s1344_s29 }
  0x1c   : > { %p148_p13 = scmp.eq.s32.totalorder %s547_s26, 7  ;;  %s72_s11 = sor.u32 %s71_s4, %s70_s10 }
  0x1d   : > { %s1309_s9 = scalar_select %p1088_p11, 1, 0 }
  0x1e   : > { %s128_s15 = sor.u32 %s73_s6, %s70_s10  ;;  %s74_s30 = sor.u32 %s73_s6, %s72_s11 }
  0x1f   : > { %p129_p0 = scmp.eq.s32.totalorder %s128_s15, 0  ;;  %p75_p1 = scmp.eq.s32.totalorder %s74_s30, 0 }
  0x20   : > { %p1096_p2 = por %p148_p13, %p147_p12  ;;  %s1312_s27 = sadd.s32 1, %s928_s17 }
  0x21   : > { %s1101_s28 = scalar_select %p129_p0, %s916_s14, %s131_s8  }
  0x22   : > { %s1310_s25 = scalar_select %p1096_p2, 1, 0 }
  0x23   : > { %s1106_s3 = scalar_select %p75_p1, %s928_s17, %s1312_s27  }
  0x24   : > { %1311 = sst [smem:[#allocation14_spill]] %s1310_s25  ;;  %p672_p3 = scmp.lt.s32.totalorder %s956_s24, 8 }
  0x25   : > { %s178_s12 = sand.u32 1, %s928_s17   ;;  %s573_s29 = sshll.u32 %s944_s21, 5 }
  0x26   : > { %s550_s26 = sshll.u32 %s178_s12, 7  ;;  %s188_s4 = sadd.s32 %s948_s22, %s573_s29 }
  0x27   : > { %s553_s10 = sshll.u32 %s952_s23, 6  ;;  %s182_s6 = scalar_lea.vmem [#allocation3], %s550_s26 }
  0x28   : > { %s193_s11 = sshll.u32 %s182_s6, 4  ;;  %s190_s15 = sadd.s32 %s553_s10, %s188_s4  ;;  %s1113_s11 = int_to_ptr.vmem [resolvable:$true] %s193_s11 }
  0x29   : > { %s554_s30 = sshll.u32 %s190_s15, 7  ;;  %p1117_p4 = pnand %p672_p3, %p1070_p5 }
  0x2a   : > { %s1124_s21 = scalar_lea.hbm %s1290_s1, %s554_s30  ;;  %s1127_s29 = scalar_lea.sflag [#allocation4], %s178_s12 }
  0x2b   : > { %s788_s26 = scalar_lea.hbm %s1124_s21, 2048  ;;  %p790_p5 = pneg %p1117_p4 }
  0x2c   : > { %p789_p8 = scmp.ne.s32.totalorder %s1124_s21, %s788_s26  ;;  %s793_s10 = scalar_lea.hbm %s1290_s1, 16384 }
  0x2d   : > { %p794_p12 = scmp.lt.u32.totalorder %s1124_s21, %s1290_s1  ;;  %p795_p13 = scmp.lt.u32.totalorder %s793_s10, %s788_s26 }
  0x2e   : > { %p791_p9 = pnand %p790_p5, %p789_p8  ;;  %p797_p1 = scmp.lt.u32.totalorder %s788_s26, %s1124_s21 }
  0x2f   : > { %p796_p0 = por %p795_p13, %p794_p12 }
  0x30   : > { %p792_p10 = pneg %p791_p9 }
  0x31   : > { %p798_p3 = por %p797_p1, %p796_p0 }
  0x33   : > { %p799_p6 = pnand %p798_p3, %p792_p10 }
  0x35   : > { %802 = shalt.err (!%p799_p6)
}
  0x36   : > { %s803_s12 = scalar_lea.vmem %s1113_s11, 2048  ;;  %s958_s30 = smov [#allocation3]  }
  0x37   : > { %p804_p8 = scmp.ne.s32.totalorder %s1113_s11, %s803_s12  ;;  %s808_s8 = sshll.u32 %s958_s30, 4  ;;  %s809_s8 = int_to_ptr.vmem [resolvable:$false] %s808_s8 }
  0x38   : > { %s810_s27 = scalar_lea.vmem %s809_s8, 4096  ;;  %p811_p11 = scmp.lt.s32.totalorder %s1113_s11, %s809_s8 }
  0x39   : > { %p806_p9 = pnand %p804_p8, %p790_p5  ;;  %p812_p12 = scmp.lt.s32.totalorder %s810_s27, %s803_s12 }
  0x3b   : > { %p807_p2 = pneg %p806_p9  ;;  %p813_p13 = por %p812_p12, %p811_p11 }
  0x3d   : > { %p814_p0 = pnand %p813_p13, %p807_p2 }
  0x3f   : > { %817 = shalt.err (!%p814_p0)
}
  0x40   : > { %s959_s26 = smov 256   ;;  %s960_s5 = smov 128  }
  0x41   : > { %s961_s4 = smov 8   ;;  %p209_p6 = scmp.lt.s32.totalorder %s956_s24, 9 }
  0x42   : > { %667 = dma.hbm_to_vmem [thread:$0]  (!%p1117_p4), %s1124_s21, 2048, %s1113_s11, %s1127_s29, %s959_s26, %s960_s5, %s961_s4  }
  0x43   : > { %p1314_p5 = scmp.ge.s32.totalorder %s956_s24, 1 }
  0x45   : > { %p210_p10 = pnand %p1314_p5, %p209_p6 }
  0x46   : > { %s215_s10 = sand.u32 (!%p210_p10), 1, %s924_s16  }
  0x47   : > { %213 = sbr.rel (%p210_p10) target bundleno = 385 (0x181), region = 32  ;;  %s556_s6 = sshll.u32 (!%p210_p10), %s215_s10, 7 }
  0x48   : > { %s216_s15 = scalar_lea.sflag (!%p210_p10), [#allocation4], %s215_s10  ;;  %s1159_s12 = scalar_lea.vmem (!%p210_p10), [#allocation3], %s556_s6 }
  0x4e   : > { %899 = dma.done.wait (%p1079_p7), %s216_s15, 2048  }
  0x4f   : > { %901 = vsyncadd (%p1079_p7), %s216_s15, 4294965248  ;;  %s251_s21 = sand.u32 1, %s912_s13   ;;  %p254_p11 = scmp.lt.s32.totalorder %s940_s20, 1 }
  0x50   : > { %s557_s25 = sshll.u32 %s251_s21, 4  ;;  %p256_p2 = scmp.lt.s32.totalorder %s932_s18, 1 }
  0x51   : > { %s255_s11 = scalar_select %p254_p11, %s940_s20, 1 }
  0x52   : > { %s257_s29 = scalar_select %p256_p2, %s932_s18, 1 }
  0x53   : > { %s558_s30 = sshll.u32 %s255_s11, 1  ;;  %s574_s8 = sshll.u32 %s255_s11, 4 }
  0x54   : > { %s259_s27 = sadd.s32 %s558_s30, %s257_s29  ;;  %s1175_s7 = scalar_lea.vmem %s1291_s2, %s574_s8 }
  0x55   : > { %s260_s6 = scalar_lea.vmem %s1289_s0, %s259_s27  ;;  %s1180_s15 = scalar_lea.vmem [#allocation6], %s557_s25 }
  0x56   : > { %p561_p7 = scmp.ne.s32.totalorder %s932_s18, 0 }
  0x57   : > { %v962_v0 = vmov (!%p561_p7), 0.0  }
  0x58   : > { %270 = sbr.rel (%p561_p7) target bundleno = 95 (0x5f), region = 40  ;;  %271 = vst [vmem:[#allocation2] sm:$0xff] (!%p561_p7), %v962_v0  ;;  %272 = vst [vmem:[#allocation2 + $0x8] sm:$0xff] (!%p561_p7), %v962_v0 }
  0x5f PF: > { %v274_v1 = vld [vmem:[%s1159_s12] sm:$0xff]  ;;  %v275_v2 = vld [vmem:[%s1159_s12 + $0x8] sm:$0xff]  ;;  %v276_v3 = vld [vmem:[%s1159_s12 + $0x10] sm:$0xff]  ;;  %v290_v4 = vlaneseq  ;;  %v963_v16 = vmov 1.0   ;;  %p567_p4 = scmp.ne.s32.totalorder %s932_s18, 1 }
  0x60   : > { %v628_v5 = vpack.c.bf16 %v275_v2, %v274_v1  ;;  %v277_v6 = vld [vmem:[%s1159_s12 + $0x18] sm:$0xff]  ;;  %v278_v8 = vld [vmem:[%s1159_s12 + $0x20] sm:$0xff]  ;;  %v279_v9 = vld [vmem:[%s1159_s12 + $0x28] sm:$0xff]  ;;  %v964_v39 = vmov (!%p567_p4), 0  }
  0x61   : > { %v632_v7 = vpack.c.bf16 %v277_v6, %v276_v3  ;;  %v291_v10 = vshrl.u32 %v290_v4, 7  ;;  %v636_v12 = vpack.c.bf16 %v279_v9, %v278_v8  ;;  %v562_v13 = vld [vmem:[%s260_s6] ss:$0 sm:$0xff]  ;;  %v281_v15 = vld [vmem:[%s1159_s12 + $0x38] sm:$0xff]  ;;  %v282_v18 = vld [vmem:[%s1159_s12 + $0x40] sm:$0xff]  ;;  %787 = vset.pattern.permute.xlu0 (!%p567_p4), %v964_v39 }
  0x62   : > { %629 = vmatprep.subr.bf16.mxu0 %v628_v5  ;;  %v280_v14 = vld [vmem:[%s1159_s12 + $0x30] sm:$0xff]  ;;  %v283_v19 = vld [vmem:[%s1159_s12 + $0x48] sm:$0xff]  ;;  %v285_v22 = vld [vmem:[%s1159_s12 + $0x58] sm:$0xff] }
  0x63   : > { %631 = vmatpush3.bf16.msra.mxu0 %v628_v5  ;;  %v293_v11 = vadd.s32 1, %v291_v10  ;;  %v640_v17 = vpack.c.bf16 %v281_v15, %v280_v14  ;;  %v644_v20 = vpack.c.bf16 %v283_v19, %v282_v18  ;;  %v284_v21 = vld [vmem:[%s1159_s12 + $0x50] sm:$0xff]  ;;  %v286_v24 = vld [vmem:[%s1159_s12 + $0x60] sm:$0xff]  ;;  %v287_v25 = vld [vmem:[%s1159_s12 + $0x68] sm:$0xff]  ;;  %v292_v29 = vadd.s32 8, %v291_v10 }
  0x64   : > { %633 = vmatprep.subr.bf16.mxu0 %v632_v7  ;;  %v648_v23 = vpack.c.bf16 %v285_v22, %v284_v21  ;;  %v652_v26 = vpack.c.bf16 %v287_v25, %v286_v24  ;;  %v288_v27 = vld [vmem:[%s1159_s12 + $0x70] sm:$0xff]  ;;  %v289_v28 = vld [vmem:[%s1159_s12 + $0x78] sm:$0xff] }
  0x65   : > { %vm299_vm0 = vcmp.eq.s32.totalorder %v293_v11, %v562_v13  ;;  %v656_v30 = vpack.c.bf16 %v289_v28, %v288_v27  ;;  %v294_v31 = vadd.s32 1, %v292_v29  ;;  %v306_v32 = vld [vmem:[#allocation2 + $0x8] sm:$0xff]  ;;  %v305_v33 = vld [vmem:[#allocation2] sm:$0xff] }
  0x66   : > { %625 = vmatprep.mubr.msk.f32.mxu0 %vm299_vm0, %v963_v16  ;;  %v392_v38 = vld [vmem:[%s1175_s7] sm:$0xff] (!%p567_p4)  ;;  %v393_v40 = vld [vmem:[%s1175_s7 + $0x8] sm:$0xff] (!%p567_p4) }
  0x67   : > { %635 = vmatpush3.bf16.msra.mxu0 %v632_v7  ;;  %vm300_vm1 = vcmp.eq.s32.totalorder %v294_v31, %v562_v13  ;;  %396 = vperm.xlu0 (!%p567_p4), %787, %v392_v38  }
  0x68   : > { %637 = vmatprep.subr.bf16.mxu0 %v636_v12 }
  0x6b   : > { %639 = vmatpush3.bf16.msra.mxu0 %v636_v12  ;;  %401 = vperm.xlu0 (!%p567_p4), %787, %v393_v40  }
  0x6c   : > { %641 = vmatprep.subr.bf16.mxu0 %v640_v17 }
  0x6f   : > { %643 = vmatpush3.bf16.msra.mxu0 %v640_v17 }
  0x70   : > { %645 = vmatprep.subr.bf16.mxu0 %v644_v20 }
  0x73   : > { %647 = vmatpush3.bf16.msra.mxu0 %v644_v20 }
  0x74   : > { %649 = vmatprep.subr.bf16.mxu0 %v648_v23 }
  0x77   : > { %651 = vmatpush3.bf16.msra.mxu0 %v648_v23 }
  0x78   : > { %653 = vmatprep.subr.bf16.mxu0 %v652_v26 }
  0x7b   : > { %655 = vmatpush3.bf16.msra.mxu0 %v652_v26 }
  0x7c   : > { %657 = vmatprep.subr.bf16.mxu0 %v656_v30 }
  0x7f   : > { %659 = vmatpush3.bf16.msra.mxu0 %v656_v30 }
  0x82   : > { %626 = vmatmul.mubr.msk.f32.vlgmr.msra.gmra.mrb[0].mxu0 %vm300_vm1, %v963_v16 }
  0xe6   : > { %v397_v42 = vpop.permute.xlu0 (!%p567_p4), %396 }
  0xea   : > { %v402_v45 = vpop.permute.xlu0 (!%p567_p4), %401 }
 0x153   : > { %389 = sbr.rel (%p567_p4) target bundleno = 356 (0x164), region = 44 }
 0x155   : > { %v627_v34 = vpop.f32.mrb[0].mxu0 }
 0x156   : > { %v383_v35 = vadd.f32 %v627_v34, %v306_v32  ;;  %v373_v36 = vpop.f32.mrb[1].mxu0 }
 0x157   : > { %v382_v37 = vadd.f32 %v373_v36, %v305_v33 }
 0x158   : > { %385 = vst [vmem:[#allocation2 + $0x8] sm:$0xff] %v383_v35 }
 0x159   : > { %384 = vst [vmem:[#allocation2] sm:$0xff] %v382_v37 }
 0x15f   : > { %v391_v44 = vld [vmem:[#allocation2 + $0x8] sm:$0xff] }
 0x160   : > { %v390_v41 = vld [vmem:[#allocation2] sm:$0xff]  ;;  %v405_v46 = vmul.f32 %v402_v45, %v391_v44 }
 0x161   : > { %v404_v43 = vmul.f32 %v397_v42, %v390_v41 }
 0x162   : > { %407 = vst [vmem:[%s1180_s15 + $0x8] sm:$0xff] %v405_v46 }
 0x163   : > { %406 = vst [vmem:[%s1180_s15] sm:$0xff] %v404_v43 }
 0x164 PF: > { %s569_s18 = sshll.u32 %s940_s20, 2  ;;  %s423_s25 = sshll.u32 %s1180_s15, 4  ;;  %s1207_s25 = int_to_ptr.vmem [resolvable:$true] %s423_s25 }
 0x165   : > { %s420_s12 = sadd.s32 %s936_s19, %s569_s18  ;;  %s1315_s8 = sld [smem:[#allocation15_spill]] }
 0x166   : > { %s570_s11 = sshll.u32 %s420_s12, 7  ;;  %s1216_s26 = scalar_lea.sflag [#allocation5], %s251_s21 }
 0x167   : > { %s818_s5 = scalar_lea.vmem %s1207_s25, 256  ;;  %p1316_p3 = scmp.ne.s32.totalorder %s1309_s9, 0 }
 0x168   : > { %p819_p1 = scmp.ne.s32.totalorder %s1207_s25, %s818_s5  ;;  %s965_s19 = smov [#allocation6]  }
 0x169   : > { %s822_s20 = sshll.u32 %s965_s19, 4  ;;  %s823_s20 = int_to_ptr.vmem [resolvable:$false] %s822_s20 }
 0x16a   : > { %p820_p8 = pnand %p819_p1, %p1316_p3  ;;  %s824_s7 = scalar_lea.vmem %s823_s20, 512 }
 0x16b   : > { %s1212_s27 = scalar_lea.hbm %s1315_s8, %s570_s11  ;;  %p825_p12 = scmp.lt.s32.totalorder %s1207_s25, %s823_s20 }
 0x16c   : > { %p821_p9 = pneg %p820_p8  ;;  %p826_p13 = scmp.lt.s32.totalorder %s824_s7, %s818_s5 }
 0x16e   : > { %p827_p0 = por %p826_p13, %p825_p12 }
 0x170   : > { %p828_p6 = pnand %p827_p0, %p821_p9 }
 0x172   : > { %831 = shalt.err (!%p828_p6)
}
 0x173   : > { %s832_s21 = scalar_lea.hbm %s1212_s27, 256  ;;  %s836_s6 = scalar_lea.hbm %s1315_s8, 1024 }
 0x174   : > { %p833_p5 = scmp.ne.s32.totalorder %s1212_s27, %s832_s21  ;;  %p837_p2 = scmp.lt.u32.totalorder %s1212_s27, %s1315_s8 }
 0x175   : > { %p838_p7 = scmp.lt.u32.totalorder %s836_s6, %s832_s21  ;;  %p840_p1 = scmp.lt.u32.totalorder %s832_s21, %s1212_s27 }
 0x176   : > { %p834_p10 = pnand %p833_p5, %p1316_p3 }
 0x177   : > { %p839_p4 = por %p838_p7, %p837_p2 }
 0x178   : > { %p835_p11 = pneg %p834_p10 }
 0x179   : > { %p841_p8 = por %p840_p1, %p839_p4 }
 0x17b   : > { %p842_p9 = pnand %p841_p8, %p835_p11 }
 0x17d   : > { %845 = shalt.err (!%p842_p9)
}
 0x17e   : > { %s966_s12 = smov 128   ;;  %s967_s11 = smov 256  }
 0x17f   : > { %s968_s29 = smov 8  }
 0x180   : > { %662 = dma.vmem_to_hbm [thread:$0]  (%p1316_p3), %s1207_s25, 256, %s1212_s27, %s1216_s26, %s966_s12, %s967_s11, %s968_s29  }
 0x181 PF: > { %s1317_s30 = sld [smem:[#allocation9_spill]]  ;;  %s1318_s5 = sld [smem:[#allocation14_spill]] }
 0x182   : > { %p673_p12 = scmp.ge.s32.totalorder %s956_s24, 2 }
 0x187   : > { %s438_s19 = sand.u32 1, %s1317_s30   ;;  %p1319_p13 = scmp.ne.s32.totalorder %s1318_s5, 0 }
 0x188   : > { %s439_s20 = scalar_lea.sflag [#allocation5], %s438_s19 }
 0x189   : > { %p669_p0 = pnand %p673_p12, %p1319_p13 }
 0x18b   : > { %903 = dma.done.wait (!%p669_p0), %s439_s20, 256  }
 0x18c   : > { %905 = vsyncadd (!%p669_p0), %s439_s20, 4294967040  ;;  %s19_s24 = sadd.s32 1, %s956_s24   ;;  %s1321_s18 = sld [smem:[#allocation10_spill]] }
 0x18d   : > { %p1245_p6 = scmp.ge.s32.totalorder %s19_s24, 10   ;;  %s1322_s21 = sld [smem:[#allocation11_spill]] }
 0x18e   : > { %s1323_s9 = sld [smem:[#allocation12_spill]]  ;;  %s1324_s25 = sld [smem:[#allocation13_spill]] }
 0x18f   : > { %s1325_s12 = smov %s912_s13  ;;  %s1326_s13 = smov %s916_s14 }
 0x190   : > { %s1327_s14 = smov %s1101_s28  ;;  %s1328_s15 = smov %s924_s16 }
 0x191   : > { %s1329_s16 = smov %s928_s17  ;;  %s1330_s17 = smov %s1106_s3 }
 0x192   : > { %s1331_s19 = smov %s948_s22  ;;  %s1332_s20 = smov %s952_s23 }
 0x193   :  { %18 = sbr.rel (!%p1245_p6) target bundleno = 12 (0xc), region = 91 }
 0x194   : > { %s1333_s22 = smov %s1323_s9  ;;  %s1334_s23 = smov %s1324_s25 }
 0x19a   :  { %444 = vsyncpa [#allocation4], 1 }
 0x19b   :  { %446 = vsyncpa [#allocation4 + $0x1], 1 }
 0x19c   :  { %447 = vsyncpa [#allocation5], 1 }
 0x19d   :  { %449 = vsyncpa [#allocation5 + $0x1], 1 }

</bundles_post_ra>
